<compile_context>
chip_gen: v7x
topology: tpu7x:2x2x1
jax: 0.10.0
libtpu: 0.0.40
codegen_flags: <defaults>
</compile_context>

<pallas_src>
import functools
import math

import jax
import jax.numpy as jnp
from jax.experimental import pallas as pl
from jax.experimental.pallas import tpu as pltpu


# ----------------------------------------------------------------------------
# Weight construction (replicates the PyTorch __init__ exactly, dim=2).
# ----------------------------------------------------------------------------
def _gaussian_taps_1d(kernel_size: int, sigma: float) -> tuple:
    """1-D taps such that taps[i] * taps[j] == the module's normalized 2-D kernel."""
    mean = (kernel_size - 1) / 2.0
    g = [
        1.0 / (sigma * math.sqrt(2.0 * math.pi))
        * math.exp(-(((t - mean) / (2.0 * sigma)) ** 2))
        for t in range(kernel_size)
    ]
    s = sum(g)
    return tuple(float(v / s) for v in g)


def _make_module_weight(channels: int, kernel_size: int, sigma: float) -> jnp.ndarray:
    """Exact JAX replica of the PyTorch buffer, shape (C, 1, K, K) (reference check)."""
    ks = [kernel_size] * 2
    sg = [float(sigma)] * 2
    grids = jnp.meshgrid(
        *[jnp.arange(s, dtype=jnp.float32) for s in ks], indexing="ij"
    )
    kernel = jnp.ones((), dtype=jnp.float32)
    for size, std, mgrid in zip(ks, sg, grids):
        mean = (size - 1) / 2.0
        kernel = kernel * (
            1.0 / (std * math.sqrt(2.0 * math.pi))
            * jnp.exp(-(((mgrid - mean) / (2.0 * std)) ** 2))
        )
    kernel = kernel / jnp.sum(kernel)
    return jnp.broadcast_to(
        kernel[None, None, :, :], (channels, 1, kernel_size, kernel_size)
    )


# ----------------------------------------------------------------------------
# Hardware-aware sizing helpers (defensive: every query has a safe fallback).
# ----------------------------------------------------------------------------
def _tpu_info():
    try:
        return pltpu.get_tpu_info()
    except Exception:
        return None


def _tensorcore_count() -> int:
    info = _tpu_info()
    if info is not None:
        for attr in ("num_tensorcores", "tensorcore_count", "num_cores",
                     "core_count", "num_tensor_cores"):
            v = getattr(info, attr, None)
            if isinstance(v, int) and v > 0:
                return v
    # Unknown -> treat as single-TC (v5e/v6e behavior).
    return 1


def _vmem_limit_bytes() -> int:
    info = _tpu_info()
    cap = getattr(info, "vmem_capacity_bytes", None) if info is not None else None
    if isinstance(cap, int) and cap > 0:
        # Half of physical VMEM, capped at 64 MiB (v7x has 64 MiB physical,
        # v5e/v6e have 128 MiB but only need <= 64 MiB scoped here).
        return int(min(cap // 2, 64 * 1024 * 1024))
    return 32 * 1024 * 1024


def _choose_block(n: int, bytes_fn, budget: int, num_cores: int,
                  multiple_of: int = 1) -> int:
    """Largest divisor of n (also divisible by `multiple_of`) whose pipeline
    footprint fits `budget`; on multi-TC parts prefer an even split with
    >= 2 pipelined steps per core."""
    cands = sorted((p for p in range(1, n + 1)
                    if n % p == 0 and p % multiple_of == 0), reverse=True)
    if not cands:
        return n
    fits = [p for p in cands if bytes_fn(p) <= budget] or [cands[-1]]
    if num_cores > 1:
        for p in fits:
            nb = n // p
            if nb % num_cores == 0 and nb >= 2 * num_cores:
                return p
    return fits[0]


# ----------------------------------------------------------------------------
# Pallas kernels.
# ----------------------------------------------------------------------------
def _symmetric_accumulate(taps, win):
    """sum_j taps[j] * win(j), exploiting taps[j] == taps[K-1-j]:
    ceil(K/2) vector multiplies per output instead of K."""
    K = len(taps)
    half = K // 2
    terms = [taps[j] * (win(j) + win(K - 1 - j)) for j in range(half)]
    if K % 2:
        terms.append(taps[half] * win(half))
    acc = terms[0]
    for t in terms[1:]:
        acc = acc + t
    return acc


def _plane_kernel(x_ref, o_ref, row_ref, *, taps, Ho, Wo):
    """Small-NC layout: block = (P, H, W); W is the lane axis.

    Row (W) pass reads shifted windows straight from the input ref (load
    slots, not VALU shuffles) and writes the intermediate to VMEM scratch;
    the column (H) pass reads shifted sublane strips from that scratch."""
    # Compute in f32 (v5e's VPU has no bf16; test inputs are f32 anyway).
    # TODO(synk): for bf16 inputs on v6e/v7x the tap math could stay in bf16.
    def w_win(j):
        return x_ref[:, :, pl.ds(j, Wo)].astype(jnp.float32)

    row_ref[...] = _symmetric_accumulate(taps, w_win)

    def h_win(i):
        return row_ref[:, pl.ds(i, Ho), :]

    o_ref[...] = _symmetric_accumulate(taps, h_win).astype(o_ref.dtype)


def _lane_kernel(x_ref, o_ref, col_ref, *, taps, Ho, Wo):
    """Lane-dense layout (NC % 128 == 0): block = (H, W, L), channels last.

    All tap shifts are on non-minor axes (H = outer, W = sublane), and every
    output store is an unmasked, 128-lane-dense vst."""
    def h_win(i):
        return x_ref[pl.ds(i, Ho), :, :].astype(jnp.float32)

    col_ref[...] = _symmetric_accumulate(taps, h_win)

    def w_win(j):
        return col_ref[:, pl.ds(j, Wo), :]

    o_ref[...] = _symmetric_accumulate(taps, w_win).astype(o_ref.dtype)


# ----------------------------------------------------------------------------
# Wrapper.
# ----------------------------------------------------------------------------
def gaussian_smoothing(x: jnp.ndarray, *, kernel_size: int, sigma: float) -> jnp.ndarray:
    """x: (N, C, H, W) -> (N, C, H-K+1, W-K+1), matching Gaussiansmoothing.forward."""
    N, C, H, W = x.shape
    K = kernel_size
    Ho, Wo = H - K + 1, W - K + 1
    taps = _gaussian_taps_1d(K, sigma)   # compile-time constants baked in

    NC = N * C
    isz = x.dtype.itemsize
    ncores = _tensorcore_count()
    vmem_limit = _vmem_limit_bytes()
    budget = int(vmem_limit * 0.75)      # headroom for compiler-internal scratch

    if NC % 128 == 0:
        # Production path: channels on the lane axis.
        xf = jnp.transpose(x.reshape(NC, H, W), (1, 2, 0))            # (H, W, NC)
        bytes_fn = lambda L: (2 * H * W * L * isz                      # 2x input buf
                              + 2 * Ho * Wo * L * isz                  # 2x output buf
                              + Ho * W * L * 4)                        # f32 scratch
        L = _choose_block(NC, bytes_fn, budget, ncores, multiple_of=128)
        kernel = functools.partial(_lane_kernel, taps=taps, Ho=Ho, Wo=Wo)
        out = pl.pallas_call(
            kernel,
            out_shape=jax.ShapeDtypeStruct((Ho, Wo, NC), x.dtype),
            grid_spec=pltpu.PrefetchScalarGridSpec(
                num_scalar_prefetch=0,
                grid=(NC // L,),
                in_specs=[pl.BlockSpec((H, W, L), lambda b: (0, 0, b))],
                out_specs=pl.BlockSpec((Ho, Wo, L), lambda b: (0, 0, b)),
                scratch_shapes=[pltpu.VMEM((Ho, W, L), jnp.float32)],
            ),
            compiler_params=pltpu.CompilerParams(
                dimension_semantics=("parallel",),
                vmem_limit_bytes=vmem_limit,
            ),
        )(xf)
        return jnp.transpose(out, (2, 0, 1)).reshape(N, C, Ho, Wo)

    # Small-NC path (the toy test): planes as the leading (grid) axis.
    xf = x.reshape(NC, H, W)
    bytes_fn = lambda P: (2 * H * W * P * isz
                          + 2 * Ho * Wo * P * isz
                          + H * Wo * P * 4)
    P = _choose_block(NC, bytes_fn, budget, ncores)
    kernel = functools.partial(_plane_kernel, taps=taps, Ho=Ho, Wo=Wo)
    out = pl.pallas_call(
        kernel,
        out_shape=jax.ShapeDtypeStruct((NC, Ho, Wo), x.dtype),
        grid_spec=pltpu.PrefetchScalarGridSpec(
            num_scalar_prefetch=0,
            grid=(NC // P,),
            in_specs=[pl.BlockSpec((P, H, W), lambda b: (b, 0, 0))],
            out_specs=pl.BlockSpec((P, Ho, Wo), lambda b: (b, 0, 0)),
            scratch_shapes=[pltpu.VMEM((P, H, Wo), jnp.float32)],
        ),
        compiler_params=pltpu.CompilerParams(
            dimension_semantics=("parallel",),
            vmem_limit_bytes=vmem_limit,
        ),
    )(xf)
    return out.reshape(N, C, Ho, Wo)


# ----------------------------------------------------------------------------
# Self-test
# ----------------------------------------------------------------------------
if __name__ == "__main__":
    kernel_size, sigma = 5, 1.0
    key = jax.random.PRNGKey(0)
    k1, k2 = jax.random.split(key)

    def reference(x, channels):
        weight = _make_module_weight(channels, kernel_size, sigma)   # (C,1,K,K)
        return jax.lax.conv_general_dilated(
            x, weight, window_strides=(1, 1), padding="VALID",
            dimension_numbers=("NCHW", "OIHW", "NCHW"),
            feature_group_count=channels)

    # Module config from the spec: channels=4, small batch/spatial (planes path).
    N, C, H, W = 2, 4, 16, 16
    x = jax.random.normal(k1, (N, C, H, W), dtype=jnp.float32)
    out = jax.block_until_ready(
        gaussian_smoothing(x, kernel_size=kernel_size, sigma=sigma))
    ref = reference(x, C)
    assert out.shape == (N, C, H - kernel_size + 1, W - kernel_size + 1)
    assert jnp.max(jnp.abs(out - ref)) < 1e-5

    # Also exercise the lane-dense (NC % 128 == 0) production layout path.
    N2, C2 = 2, 64
    x2 = jax.random.normal(k2, (N2, C2, H, W), dtype=jnp.float32)
    out2 = jax.block_until_ready(
        gaussian_smoothing(x2, kernel_size=kernel_size, sigma=sigma))
    ref2 = reference(x2, C2)
    assert out2.shape == (N2, C2, H - kernel_size + 1, W - kernel_size + 1)
    assert jnp.max(jnp.abs(out2 - ref2)) < 1e-5

    print("KERNEL_OK")
</pallas_src>

<mosaic_0001>
module attributes {stable_mosaic.version = 11 : i64} {
  func.func @_plane_kernel(%arg0: i32, %arg1: memref<8x16x16xf32, #tpu.memory_space<vmem>>, %arg2: memref<8x12x12xf32, #tpu.memory_space<vmem>>, %arg3: memref<8x16x12xf32, #tpu.memory_space<vmem>>) attributes {dimension_semantics = [#tpu.dimension_semantics<parallel>], iteration_bounds = array<i64: 1>, scalar_prefetch = 0 : i64, scratch_operands = 1 : i64, tpu.core_type = #tpu.core_type<tc>, window_params = [{transform_indices = @transform_0, window_bounds = array<i64: 8, 16, 16>}, {transform_indices = @transform_1, window_bounds = array<i64: 8, 12, 12>}]} {
    %c0 = arith.constant 0 : index
    %c0_0 = arith.constant 0 : index
    %c0_1 = arith.constant 0 : index
    %0 = vector.load %arg1[%c0, %c0_0, %c0_1] : memref<8x16x16xf32, #tpu.memory_space<vmem>>, vector<8x16x12xf32>
    %c0_2 = arith.constant 0 : index
    %c0_3 = arith.constant 0 : index
    %c4 = arith.constant 4 : index
    %1 = vector.load %arg1[%c0_2, %c0_3, %c4] : memref<8x16x16xf32, #tpu.memory_space<vmem>>, vector<8x16x12xf32>
    %2 = arith.addf %0, %1 : vector<8x16x12xf32>
    %cst = arith.constant 0.111703366 : f32
    %3 = vector.broadcast %cst : f32 to vector<8x16x12xf32>
    %4 = arith.mulf %3, %2 : vector<8x16x12xf32>
    %c0_4 = arith.constant 0 : index
    %c0_5 = arith.constant 0 : index
    %c1 = arith.constant 1 : index
    %5 = vector.load %arg1[%c0_4, %c0_5, %c1] : memref<8x16x16xf32, #tpu.memory_space<vmem>>, vector<8x16x12xf32>
    %c0_6 = arith.constant 0 : index
    %c0_7 = arith.constant 0 : index
    %c3 = arith.constant 3 : index
    %6 = vector.load %arg1[%c0_6, %c0_7, %c3] : memref<8x16x16xf32, #tpu.memory_space<vmem>>, vector<8x16x12xf32>
    %7 = arith.addf %5, %6 : vector<8x16x12xf32>
    %cst_8 = arith.constant 0.236476019 : f32
    %8 = vector.broadcast %cst_8 : f32 to vector<8x16x12xf32>
    %9 = arith.mulf %8, %7 : vector<8x16x12xf32>
    %c0_9 = arith.constant 0 : index
    %c0_10 = arith.constant 0 : index
    %c2 = arith.constant 2 : index
    %10 = vector.load %arg1[%c0_9, %c0_10, %c2] : memref<8x16x16xf32, #tpu.memory_space<vmem>>, vector<8x16x12xf32>
    %cst_11 = arith.constant 0.30364123 : f32
    %11 = vector.broadcast %cst_11 : f32 to vector<8x16x12xf32>
    %12 = arith.mulf %11, %10 : vector<8x16x12xf32>
    %13 = arith.addf %4, %9 : vector<8x16x12xf32>
    %14 = arith.addf %13, %12 : vector<8x16x12xf32>
    %c0_12 = arith.constant 0 : index
    %c0_13 = arith.constant 0 : index
    %c0_14 = arith.constant 0 : index
    %15 = vector.load %arg3[%c0_12, %c0_13, %c0_14] : memref<8x16x12xf32, #tpu.memory_space<vmem>>, vector<8x16x12xf32>
    tpu.vector_store %arg3[%c0_12, %c0_13, %c0_14], %14 {strides = array<i32>} : memref<8x16x12xf32, #tpu.memory_space<vmem>>, vector<8x16x12xf32>,
    %c0_15 = arith.constant 0 : index
    %c0_16 = arith.constant 0 : index
    %c0_17 = arith.constant 0 : index
    %16 = vector.load %arg3[%c0_15, %c0_16, %c0_17] : memref<8x16x12xf32, #tpu.memory_space<vmem>>, vector<8x12x12xf32>
    %c0_18 = arith.constant 0 : index
    %c4_19 = arith.constant 4 : index
    %c0_20 = arith.constant 0 : index
    %17 = vector.load %arg3[%c0_18, %c4_19, %c0_20] : memref<8x16x12xf32, #tpu.memory_space<vmem>>, vector<8x12x12xf32>
    %18 = arith.addf %16, %17 : vector<8x12x12xf32>
    %cst_21 = arith.constant 0.111703366 : f32
    %19 = vector.broadcast %cst_21 : f32 to vector<8x12x12xf32>
    %20 = arith.mulf %19, %18 : vector<8x12x12xf32>
    %c0_22 = arith.constant 0 : index
    %c1_23 = arith.constant 1 : index
    %c0_24 = arith.constant 0 : index
    %21 = vector.load %arg3[%c0_22, %c1_23, %c0_24] : memref<8x16x12xf32, #tpu.memory_space<vmem>>, vector<8x12x12xf32>
    %c0_25 = arith.constant 0 : index
    %c3_26 = arith.constant 3 : index
    %c0_27 = arith.constant 0 : index
    %22 = vector.load %arg3[%c0_25, %c3_26, %c0_27] : memref<8x16x12xf32, #tpu.memory_space<vmem>>, vector<8x12x12xf32>
    %23 = arith.addf %21, %22 : vector<8x12x12xf32>
    %cst_28 = arith.constant 0.236476019 : f32
    %24 = vector.broadcast %cst_28 : f32 to vector<8x12x12xf32>
    %25 = arith.mulf %24, %23 : vector<8x12x12xf32>
    %c0_29 = arith.constant 0 : index
    %c2_30 = arith.constant 2 : index
    %c0_31 = arith.constant 0 : index
    %26 = vector.load %arg3[%c0_29, %c2_30, %c0_31] : memref<8x16x12xf32, #tpu.memory_space<vmem>>, vector<8x12x12xf32>
    %cst_32 = arith.constant 0.30364123 : f32
    %27 = vector.broadcast %cst_32 : f32 to vector<8x12x12xf32>
    %28 = arith.mulf %27, %26 : vector<8x12x12xf32>
    %29 = arith.addf %20, %25 : vector<8x12x12xf32>
    %30 = arith.addf %29, %28 : vector<8x12x12xf32>
    %c0_33 = arith.constant 0 : index
    %c0_34 = arith.constant 0 : index
    %c0_35 = arith.constant 0 : index
    %31 = vector.load %arg2[%c0_33, %c0_34, %c0_35] : memref<8x12x12xf32, #tpu.memory_space<vmem>>, vector<8x12x12xf32>
    tpu.vector_store %arg2[%c0_33, %c0_34, %c0_35], %30 {strides = array<i32>} : memref<8x12x12xf32, #tpu.memory_space<vmem>>, vector<8x12x12xf32>,
    return
  }
  func.func @transform_0(%arg0: i32) -> (i32, i32, i32) {
    %c0_i32 = arith.constant 0 : i32
    %c0_i32_0 = arith.constant 0 : i32
    %c0_i32_1 = arith.constant 0 : i32
    return %arg0, %c0_i32, %c0_i32_0 : i32, i32, i32
  }
  func.func @transform_1(%arg0: i32) -> (i32, i32, i32) {
    %c0_i32 = arith.constant 0 : i32
    %c0_i32_0 = arith.constant 0 : i32
    %c0_i32_1 = arith.constant 0 : i32
    return %arg0, %c0_i32, %c0_i32_0 : i32, i32, i32
  }
}

</mosaic_0001>

<bundles_post_ra>
// kernel: tpu_custom_call.1
= control target key start
LH: loop header
LB: loop body
LE: loop exit
PB: predicated region body
PF: predicated region fallthrough
CT: control target
= control target key end

     0   :  { %6 = vsyncpa [#allocation4], 0  ;;  %s651_s6 = smov [#allocation3]   ;;  %s964_s0 = inlined_call_operand.hbm [shape: f32[8,16,16], index: 0, kind: input, shape index: {}]   ;;  %s965_s1 = inlined_call_operand.vmem [shape: f32[8,12,12], index: 1, kind: output, shape index: {}]  }
   0x1   :  { %s12_s7 = sshll.u32 %s651_s6, 4  ;;  %s627_s10 = scalar_lea.hbm %s964_s0, 2048  ;;  %s13_s7 = int_to_ptr.vmem [resolvable:$true] %s12_s7 }
   0x2   :  { %p628_p0 = scmp.ne.s32.totalorder %s964_s0, %s627_s10  ;;  %p631_p1 = scmp.lt.u32.totalorder %s627_s10, %s964_s0 }
   0x4   :  { %p633_p2 = pnand %p631_p1, %p628_p0 }
   0x6   :  { %636 = shalt.err (!%p633_p2)
}
   0x7   :  { %s637_s15 = scalar_lea.vmem %s13_s7, 2048  ;;  %p642_p4 = scmp.lt.s32.totalorder %s13_s7, %s13_s7 }
   0x8   :  { %p638_p3 = scmp.ne.s32.totalorder %s13_s7, %s637_s15  ;;  %p643_p5 = scmp.lt.s32.totalorder %s637_s15, %s637_s15 }
   0xa   :  { %p644_p6 = por %p643_p5, %p642_p4 }
   0xc   :  { %p645_p7 = pnand %p644_p6, %p638_p3 }
   0xe   :  { %648 = shalt.err (!%p645_p7)
}
   0xf   :  { %s652_s16 = smov 128   ;;  %s653_s17 = smov 8  }
  0x10   :  { %18 = dma.hbm_to_vmem [thread:$0]  %s964_s0, 2048, %s13_s7, [#allocation4], %s652_s16, %s652_s16, %s653_s17  }
  0x11   :  { %649 = dma.done.wait [#allocation4], 2048  }
  0x12   :  { %650 = vsyncadd [#allocation4], 4294965248  ;;  %v679_v0 = vld [vmem:[#allocation3] sm:$0xff]  ;;  %v681_v1 = vld [vmem:[#allocation3 + $0x10] sm:$0xff]  ;;  %s654_s20 = smov 126   ;;  %s655_s0 = smov 124  }
  0x13   :  { %134 = vrot.lane.b32.xlu0 %v679_v0, %s654_s20  ;;  %138 = vrot.lane.b32.xlu1 %v681_v1, %s654_s20  ;;  %v687_v2 = vld [vmem:[#allocation3 + $0x8] sm:$0xff]  ;;  %v689_v3 = vld [vmem:[#allocation3 + $0x18] sm:$0xff]  ;;  %v695_v4 = vld [vmem:[#allocation3 + $0x20] sm:$0xff]  ;;  %v214_v16 = vmul.f32 0.30364123, %v679_v0  ;;  %s656_s21 = smov 127  }
  0x14   :  { %v697_v5 = vld [vmem:[#allocation3 + $0x28] sm:$0xff]  ;;  %v703_v6 = vld [vmem:[#allocation3 + $0x30] sm:$0xff]  ;;  %v705_v7 = vld [vmem:[#allocation3 + $0x38] sm:$0xff]  ;;  %v215_v17 = vmul.f32 0.30364123, %v687_v2  ;;  %vm390_vm0 = vcmask 97280  }
  0x15   :  { %v711_v8 = vld [vmem:[#allocation3 + $0x40] sm:$0xff]  ;;  %v713_v9 = vld [vmem:[#allocation3 + $0x48] sm:$0xff]  ;;  %v719_v10 = vld [vmem:[#allocation3 + $0x50] sm:$0xff]  ;;  %v216_v18 = vmul.f32 0.30364123, %v681_v1  ;;  %vm600_vm1 = vcmask 93184  }
  0x16   :  { %v721_v11 = vld [vmem:[#allocation3 + $0x58] sm:$0xff]  ;;  %v727_v12 = vld [vmem:[#allocation3 + $0x60] sm:$0xff]  ;;  %v729_v13 = vld [vmem:[#allocation3 + $0x68] sm:$0xff]  ;;  %v217_v19 = vmul.f32 0.30364123, %v689_v3 }
  0x17   :  { %136 = vrot.lane.b32.xlu0 %v687_v2, %s654_s20  ;;  %140 = vrot.lane.b32.xlu1 %v689_v3, %s654_s20  ;;  %v735_v14 = vld [vmem:[#allocation3 + $0x70] sm:$0xff]  ;;  %v737_v15 = vld [vmem:[#allocation3 + $0x78] sm:$0xff]  ;;  %v218_v20 = vmul.f32 0.30364123, %v695_v4  ;;  %v219_v21 = vmul.f32 0.30364123, %v697_v5 }
  0x18   :  { %v220_v22 = vmul.f32 0.30364123, %v703_v6  ;;  %v221_v23 = vmul.f32 0.30364123, %v705_v7  ;;  %v222_v24 = vmul.f32 0.30364123, %v711_v8 }
  0x19   :  { %v223_v25 = vmul.f32 0.30364123, %v713_v9  ;;  %v224_v26 = vmul.f32 0.30364123, %v719_v10  ;;  %v225_v27 = vmul.f32 0.30364123, %v721_v11 }
  0x1a   :  { %v226_v28 = vmul.f32 0.30364123, %v727_v12  ;;  %v227_v29 = vmul.f32 0.30364123, %v729_v13 }
  0x1b   :  { %142 = vrot.lane.b32.xlu0 %v695_v4, %s654_s20  ;;  %144 = vrot.lane.b32.xlu1 %v697_v5, %s654_s20 }
  0x1f   :  { %146 = vrot.lane.b32.xlu0 %v703_v6, %s654_s20  ;;  %148 = vrot.lane.b32.xlu1 %v705_v7, %s654_s20 }
  0x23   :  { %150 = vrot.lane.b32.xlu0 %v711_v8, %s654_s20  ;;  %152 = vrot.lane.b32.xlu1 %v713_v9, %s654_s20 }
  0x27   :  { %154 = vrot.lane.b32.xlu0 %v719_v10, %s654_s20  ;;  %156 = vrot.lane.b32.xlu1 %v721_v11, %s654_s20 }
  0x2b   :  { %158 = vrot.lane.b32.xlu0 %v727_v12, %s654_s20  ;;  %160 = vrot.lane.b32.xlu1 %v729_v13, %s654_s20 }
  0x2f   :  { %162 = vrot.lane.b32.xlu0 %v735_v14, %s654_s20  ;;  %164 = vrot.lane.b32.xlu1 %v737_v15, %s654_s20 }
  0x33   :  { %54 = vrot.lane.b32.xlu0 %v679_v0, %s655_s0  ;;  %56 = vrot.lane.b32.xlu1 %v687_v2, %s655_s0 }
  0x37   :  { %58 = vrot.lane.b32.xlu0 %v681_v1, %s655_s0  ;;  %60 = vrot.lane.b32.xlu1 %v689_v3, %s655_s0 }
  0x3b   :  { %62 = vrot.lane.b32.xlu0 %v695_v4, %s655_s0  ;;  %64 = vrot.lane.b32.xlu1 %v697_v5, %s655_s0 }
  0x3f   :  { %66 = vrot.lane.b32.xlu0 %v703_v6, %s655_s0  ;;  %68 = vrot.lane.b32.xlu1 %v705_v7, %s655_s0 }
  0x43   :  { %70 = vrot.lane.b32.xlu0 %v711_v8, %s655_s0  ;;  %72 = vrot.lane.b32.xlu1 %v713_v9, %s655_s0 }
  0x47   :  { %74 = vrot.lane.b32.xlu0 %v719_v10, %s655_s0  ;;  %76 = vrot.lane.b32.xlu1 %v721_v11, %s655_s0 }
  0x4b   :  { %78 = vrot.lane.b32.xlu0 %v727_v12, %s655_s0  ;;  %80 = vrot.lane.b32.xlu1 %v729_v13, %s655_s0 }
  0x4f   :  { %82 = vrot.lane.b32.xlu0 %v735_v14, %s655_s0  ;;  %84 = vrot.lane.b32.xlu1 %v737_v15, %s655_s0 }
  0x53   :  { %326 = vrot.lane.b32.xlu0 %v214_v16, %s654_s20  ;;  %328 = vrot.lane.b32.xlu1 %v215_v17, %s654_s20 }
  0x57   :  { %330 = vrot.lane.b32.xlu0 %v216_v18, %s654_s20  ;;  %332 = vrot.lane.b32.xlu1 %v217_v19, %s654_s20 }
  0x5b   :  { %334 = vrot.lane.b32.xlu0 %v218_v20, %s654_s20  ;;  %336 = vrot.lane.b32.xlu1 %v219_v21, %s654_s20 }
  0x5f   :  { %338 = vrot.lane.b32.xlu0 %v220_v22, %s654_s20  ;;  %340 = vrot.lane.b32.xlu1 %v221_v23, %s654_s20 }
  0x63   :  { %342 = vrot.lane.b32.xlu0 %v222_v24, %s654_s20  ;;  %344 = vrot.lane.b32.xlu1 %v223_v25, %s654_s20 }
  0x67   :  { %346 = vrot.lane.b32.xlu0 %v224_v26, %s654_s20  ;;  %348 = vrot.lane.b32.xlu1 %v225_v27, %s654_s20 }
  0x6b   :  { %350 = vrot.lane.b32.xlu0 %v226_v28, %s654_s20  ;;  %352 = vrot.lane.b32.xlu1 %v227_v29, %s654_s20 }
  0x85   :  { %v135_v30 = vpop.permute.xlu0 %134  ;;  %v139_v31 = vpop.permute.xlu1 %138 }
  0x86   :  { %v182_v32 = vadd.f32 %v135_v30, %v679_v0  ;;  %v184_v33 = vadd.f32 %v139_v31, %v681_v1  ;;  %v228_v31 = vmul.f32 0.30364123, %v735_v14 }
  0x88   :  { %v198_v34 = vmul.f32 0.23647602, %v182_v32  ;;  %v200_v37 = vmul.f32 0.23647602, %v184_v33 }
  0x89   :  { %v137_v35 = vpop.permute.xlu0 %136  ;;  %v141_v36 = vpop.permute.xlu1 %140 }
  0x8a   :  { %v183_v38 = vadd.f32 %v137_v35, %v687_v2  ;;  %246 = vrot.lane.b32.xlu0 %v198_v34, %s656_s21  ;;  %v185_v39 = vadd.f32 %v141_v36, %v689_v3  ;;  %v229_v34 = vmul.f32 0.30364123, %v737_v15 }
  0x8c   :  { %v199_v40 = vmul.f32 0.23647602, %v183_v38  ;;  %v201_v43 = vmul.f32 0.23647602, %v185_v39 }
  0x8d   :  { %v143_v41 = vpop.permute.xlu0 %142  ;;  %v145_v42 = vpop.permute.xlu1 %144 }
  0x8e   :  { %v186_v44 = vadd.f32 %v143_v41, %v695_v4  ;;  %248 = vrot.lane.b32.xlu1 %v199_v40, %s656_s21  ;;  %250 = vrot.lane.b32.xlu0 %v200_v37, %s656_s21  ;;  %v187_v45 = vadd.f32 %v145_v42, %v697_v5 }
  0x90   :  { %v202_v46 = vmul.f32 0.23647602, %v186_v44  ;;  %v203_v49 = vmul.f32 0.23647602, %v187_v45 }
  0x91   :  { %v147_v47 = vpop.permute.xlu0 %146  ;;  %v149_v48 = vpop.permute.xlu1 %148 }
  0x92   :  { %v188_v50 = vadd.f32 %v147_v47, %v703_v6  ;;  %252 = vrot.lane.b32.xlu1 %v201_v43, %s656_s21  ;;  %254 = vrot.lane.b32.xlu0 %v202_v46, %s656_s21  ;;  %v189_v51 = vadd.f32 %v149_v48, %v705_v7 }
  0x94   :  { %v204_v52 = vmul.f32 0.23647602, %v188_v50  ;;  %v205_v55 = vmul.f32 0.23647602, %v189_v51 }
  0x95   :  { %v151_v53 = vpop.permute.xlu0 %150  ;;  %v153_v54 = vpop.permute.xlu1 %152 }
  0x96   :  { %v190_v56 = vadd.f32 %v151_v53, %v711_v8  ;;  %256 = vrot.lane.b32.xlu1 %v203_v49, %s656_s21  ;;  %258 = vrot.lane.b32.xlu0 %v204_v52, %s656_s21  ;;  %v191_v57 = vadd.f32 %v153_v54, %v713_v9 }
  0x98   :  { %v206_v58 = vmul.f32 0.23647602, %v190_v56  ;;  %v207_v61 = vmul.f32 0.23647602, %v191_v57 }
  0x99   :  { %v155_v59 = vpop.permute.xlu0 %154  ;;  %v157_v60 = vpop.permute.xlu1 %156 }
  0x9a   :  { %v192_v62 = vadd.f32 %v155_v59, %v719_v10  ;;  %260 = vrot.lane.b32.xlu1 %v205_v55, %s656_s21  ;;  %262 = vrot.lane.b32.xlu0 %v206_v58, %s656_s21  ;;  %v193_v63 = vadd.f32 %v157_v60, %v721_v11 }
  0x9c   :  { %v208_v16 = vmul.f32 0.23647602, %v192_v62  ;;  %v209_v19 = vmul.f32 0.23647602, %v193_v63 }
  0x9d   :  { %v159_v17 = vpop.permute.xlu0 %158  ;;  %v161_v18 = vpop.permute.xlu1 %160 }
  0x9e   :  { %v194_v20 = vadd.f32 %v159_v17, %v727_v12  ;;  %264 = vrot.lane.b32.xlu1 %v207_v61, %s656_s21  ;;  %266 = vrot.lane.b32.xlu0 %v208_v16, %s656_s21  ;;  %v195_v21 = vadd.f32 %v161_v18, %v729_v13 }
  0xa0   :  { %v210_v22 = vmul.f32 0.23647602, %v194_v20  ;;  %v211_v25 = vmul.f32 0.23647602, %v195_v21 }
  0xa1   :  { %v163_v23 = vpop.permute.xlu0 %162  ;;  %v165_v24 = vpop.permute.xlu1 %164 }
  0xa2   :  { %v196_v26 = vadd.f32 %v163_v23, %v735_v14  ;;  %268 = vrot.lane.b32.xlu1 %v209_v19, %s656_s21  ;;  %270 = vrot.lane.b32.xlu0 %v210_v22, %s656_s21  ;;  %v197_v27 = vadd.f32 %v165_v24, %v737_v15 }
  0xa4   :  { %v212_v28 = vmul.f32 0.23647602, %v196_v26  ;;  %v213_v30 = vmul.f32 0.23647602, %v197_v27 }
  0xa5   :  { %v55_v29 = vpop.permute.xlu0 %54  ;;  %v57_v32 = vpop.permute.xlu1 %56 }
  0xa6   :  { %272 = vrot.lane.b32.xlu1 %v211_v25, %s656_s21  ;;  %274 = vrot.lane.b32.xlu0 %v212_v28, %s656_s21  ;;  %v102_v61 = vadd.f32 %v55_v29, %v679_v0  ;;  %v103_v62 = vadd.f32 %v57_v32, %v687_v2 }
  0xa8   :  { %v118_v16 = vmul.f32 0.111703366, %v102_v61  ;;  %v119_v20 = vmul.f32 0.111703366, %v103_v62 }
  0xa9   :  { %v59_v33 = vpop.permute.xlu0 %58  ;;  %v61_v35 = vpop.permute.xlu1 %60 }
  0xaa   :  { %276 = vrot.lane.b32.xlu1 %v213_v30, %s656_s21  ;;  %354 = vrot.lane.b32.xlu0 %v228_v31, %s654_s20  ;;  %v104_v17 = vadd.f32 %v59_v33, %v681_v1  ;;  %v105_v22 = vadd.f32 %v61_v35, %v689_v3 }
  0xac   :  { %v120_v21 = vmul.f32 0.111703366, %v104_v17  ;;  %v121_v28 = vmul.f32 0.111703366, %v105_v22 }
  0xad   :  { %v63_v36 = vpop.permute.xlu0 %62  ;;  %v65_v37 = vpop.permute.xlu1 %64 }
  0xae   :  { %356 = vrot.lane.b32.xlu1 %v229_v34, %s654_s20  ;;  %v106_v23 = vadd.f32 %v63_v36, %v695_v4  ;;  %v107_v25 = vadd.f32 %v65_v37, %v697_v5 }
  0xb0   :  { %v122_v29 = vmul.f32 0.111703366, %v106_v23  ;;  %v123_v32 = vmul.f32 0.111703366, %v107_v25 }
  0xb1   :  { %v67_v38 = vpop.permute.xlu0 %66  ;;  %v69_v39 = vpop.permute.xlu1 %68 }
  0xb2   :  { %v108_v1 = vadd.f32 %v67_v38, %v703_v6  ;;  %v109_v3 = vadd.f32 %v69_v39, %v705_v7 }
  0xb4   :  { %v124_v6 = vmul.f32 0.111703366, %v108_v1 }
  0xb5   :  { %v71_v40 = vpop.permute.xlu0 %70  ;;  %v73_v41 = vpop.permute.xlu1 %72 }
  0xb6   :  { %v110_v34 = vadd.f32 %v71_v40, %v711_v8  ;;  %v111_v5 = vadd.f32 %v73_v41, %v713_v9  ;;  %v125_v9 = vmul.f32 0.111703366, %v109_v3 }
  0xb8   :  { %v127_v61 = vmul.f32 0.111703366, %v111_v5 }
  0xb9   :  { %v75_v42 = vpop.permute.xlu0 %74  ;;  %v77_v43 = vpop.permute.xlu1 %76 }
  0xba   :  { %v112_v37 = vadd.f32 %v75_v42, %v719_v10  ;;  %v113_v38 = vadd.f32 %v77_v43, %v721_v11 }
  0xbc   :  { %v128_v11 = vmul.f32 0.111703366, %v112_v37  ;;  %v863_v43 = vmul.f32 0.111703366, %v113_v38 }
  0xbd   :  { %v79_v44 = vpop.permute.xlu0 %78  ;;  %v81_v45 = vpop.permute.xlu1 %80 }
  0xbe   :  { %v115_v7 = vadd.f32 %v81_v45, %v729_v13 }
  0xc1   :  { %v83_v46 = vpop.permute.xlu0 %82  ;;  %v823_v47 = vpop.permute.xlu1 %84 }
  0xc2   :  { %v116_v39 = vadd.f32 %v83_v46, %v735_v14  ;;  %v117_v13 = vadd.f32 %v823_v47, %v737_v15  ;;  %v869_v14 = vmul.f32 0.111703366, %v115_v7 }
  0xc5   :  { %v327_v48 = vpop.permute.xlu0 %326  ;;  %v329_v49 = vpop.permute.xlu1 %328 }
  0xc9   :  { %v331_v50 = vpop.permute.xlu0 %330  ;;  %v333_v51 = vpop.permute.xlu1 %332 }
  0xcd   :  { %v335_v52 = vpop.permute.xlu0 %334  ;;  %v825_v53 = vpop.permute.xlu1 %336 }
  0xd1   :  { %v827_v54 = vpop.permute.xlu0 %338  ;;  %v829_v55 = vpop.permute.xlu1 %340 }
  0xd5   :  { %v831_v56 = vpop.permute.xlu0 %342  ;;  %v833_v57 = vpop.permute.xlu1 %344 }
  0xd9   :  { %v835_v58 = vpop.permute.xlu0 %346  ;;  %v837_v59 = vpop.permute.xlu1 %348 }
  0xdd   :  { %v839_v60 = vpop.permute.xlu0 %350  ;;  %v843_v63 = vpop.permute.xlu1 %352 }
  0xfc   :  { %v247_v18 = vpop.permute.xlu0 %246 }
  0xfd   :  { %v294_v19 = vadd.f32 %v247_v18, %v118_v16 }
  0xff   :  { %v374_v24 = vadd.f32 %v327_v48, %v294_v19  ;;  %v114_v48 = vadd.f32 %v79_v44, %v727_v12  ;;  %v871_v44 = vmul.f32 0.111703366, %v116_v39 }
 0x100   :  { %v249_v0 = vpop.permute.xlu1 %248  ;;  %v251_v26 = vpop.permute.xlu0 %250 }
 0x101   :  { %391 = vst.msk [vmem:[#allocation2] sm:$0xff] %vm390_vm0, %v374_v24  ;;  %v295_v2 = vadd.f32 %v249_v0, %v119_v20  ;;  %v296_v27 = vadd.f32 %v251_v26, %v120_v21  ;;  %v865_v12 = vmul.f32 0.111703366, %v114_v48  ;;  %v877_v24 = vmul.f32 0.111703366, %v117_v13 }
 0x103   :  { %v375_v30 = vadd.f32 %v329_v49, %v295_v2  ;;  %v376_v31 = vadd.f32 %v331_v50, %v296_v27  ;;  %v126_v50 = vmul.f32 0.111703366, %v110_v34 }
 0x104   :  { %v253_v33 = vpop.permute.xlu1 %252  ;;  %v255_v4 = vpop.permute.xlu0 %254 }
 0x105   :  { %392 = vst.msk [vmem:[#allocation2 + $0x8] sm:$0xff] %vm390_vm0, %v375_v30  ;;  %393 = vst.msk [vmem:[#allocation2 + $0x10] sm:$0xff] %vm390_vm0, %v376_v31  ;;  %v297_v35 = vadd.f32 %v253_v33, %v121_v28  ;;  %v298_v36 = vadd.f32 %v255_v4, %v122_v29 }
 0x107   :  { %v377_v8 = vadd.f32 %v333_v51, %v297_v35  ;;  %v378_v40 = vadd.f32 %v335_v52, %v298_v36 }
 0x108   :  { %v257_v41 = vpop.permute.xlu1 %256  ;;  %v259_v49 = vpop.permute.xlu0 %258  ;;  %v407_v45 = vld [vmem:[#allocation2] sm:$0xff] }
 0x109   :  { %394 = vst.msk [vmem:[#allocation2 + $0x18] sm:$0xff] %vm390_vm0, %v377_v8  ;;  %395 = vst.msk [vmem:[#allocation2 + $0x20] sm:$0xff] %vm390_vm0, %v378_v40  ;;  %v299_v10 = vadd.f32 %v257_v41, %v123_v32  ;;  %v300_v42 = vadd.f32 %v259_v49, %v124_v6 }
 0x10b   :  { %v379_v46 = vadd.f32 %v825_v53, %v299_v10  ;;  %v380_v51 = vadd.f32 %v827_v54, %v300_v42 }
 0x10c   :  { %v408_v52 = vld [vmem:[#allocation2 + $0x8] sm:$0xf]  ;;  %v424_v16 = vld [vmem:[#allocation2 + $0xc] sm:$0xf]  ;;  %v261_v17 = vpop.permute.xlu1 %260  ;;  %v263_v18 = vpop.permute.xlu0 %262  ;;  %v409_v29 = vld [vmem:[#allocation2 + $0x10] sm:$0xff] }
 0x10d   :  { %v423_v62 = vld [vmem:[#allocation2 + $0x4] sm:$0xff]  ;;  %v440_v20 = vadd.f32 %v424_v16, %v408_v52  ;;  %396 = vst.msk [vmem:[#allocation2 + $0x28] sm:$0xff] %vm390_vm0, %v379_v46  ;;  %397 = vst.msk [vmem:[#allocation2 + $0x30] sm:$0xff] %vm390_vm0, %v380_v51  ;;  %v301_v15 = vadd.f32 %v261_v17, %v125_v9  ;;  %v302_v47 = vadd.f32 %v263_v18, %v126_v50 }
 0x10e   :  { %v439_v19 = vadd.f32 %v423_v62, %v407_v45  ;;  %v471_v21 = vld [vmem:[#allocation2 + $0x1] sm:$0xff]  ;;  %v472_v22 = vld [vmem:[#allocation2 + $0x9] sm:$0xf] }
 0x10f   :  { %v487_v23 = vld [vmem:[#allocation2 + $0x3] sm:$0xff]  ;;  %v488_v53 = vld [vmem:[#allocation2 + $0xb] sm:$0xf]  ;;  %v456_v26 = vmul.f32 0.111703366, %v440_v20  ;;  %v381_v31 = vadd.f32 %v829_v55, %v301_v15  ;;  %v382_v32 = vadd.f32 %v831_v56, %v302_v47 }
 0x110   :  { %v503_v54 = vadd.f32 %v487_v23, %v471_v21  ;;  %v535_v25 = vld [vmem:[#allocation2 + $0x2] sm:$0xff]  ;;  %v455_v0 = vmul.f32 0.111703366, %v439_v19  ;;  %v504_v2 = vadd.f32 %v488_v53, %v472_v22  ;;  %v536_v27 = vld [vmem:[#allocation2 + $0xa] sm:$0xf]  ;;  %v425_v30 = vld [vmem:[#allocation2 + $0x14] sm:$0xff]  ;;  %v265_v3 = vpop.permute.xlu1 %264  ;;  %v267_v33 = vpop.permute.xlu0 %266 }
 0x111   :  { %v551_v28 = vmul.f32 0.30364123, %v535_v25  ;;  %v410_v34 = vld [vmem:[#allocation2 + $0x18] sm:$0xf]  ;;  %v426_v5 = vld [vmem:[#allocation2 + $0x1c] sm:$0xf]  ;;  %v441_v35 = vadd.f32 %v425_v30, %v409_v29  ;;  %v303_v36 = vadd.f32 %v265_v3, %v127_v61  ;;  %v304_v6 = vadd.f32 %v267_v33, %v128_v11 }
 0x112   :  { %v519_v1 = vmul.f32 0.23647602, %v503_v54  ;;  %v520_v4 = vmul.f32 0.23647602, %v504_v2  ;;  %v552_v37 = vmul.f32 0.30364123, %v536_v27  ;;  %v442_v48 = vadd.f32 %v426_v5, %v410_v34 }
 0x113   :  { %v473_v7 = vld [vmem:[#allocation2 + $0x11] sm:$0xff]  ;;  %v474_v39 = vld [vmem:[#allocation2 + $0x19] sm:$0xf]  ;;  %398 = vst.msk [vmem:[#allocation2 + $0x38] sm:$0xff] %vm390_vm0, %v381_v31  ;;  %399 = vst.msk [vmem:[#allocation2 + $0x40] sm:$0xff] %vm390_vm0, %v382_v32  ;;  %v383_v49 = vadd.f32 %v833_v57, %v303_v36  ;;  %v384_v17 = vadd.f32 %v835_v58, %v304_v6 }
 0x114   :  { %v567_v38 = vadd.f32 %v519_v1, %v455_v0  ;;  %v489_v8 = vld [vmem:[#allocation2 + $0x13] sm:$0xff]  ;;  %v568_v55 = vadd.f32 %v520_v4, %v456_v26  ;;  %v457_v56 = vmul.f32 0.111703366, %v441_v35  ;;  %v490_v40 = vld [vmem:[#allocation2 + $0x1b] sm:$0xf]  ;;  %v411_v13 = vld [vmem:[#allocation2 + $0x20] sm:$0xff]  ;;  %v269_v45 = vpop.permute.xlu1 %268  ;;  %v271_v46 = vpop.permute.xlu0 %270 }
 0x115   :  { %v505_v9 = vadd.f32 %v489_v8, %v473_v7  ;;  %v537_v41 = vld [vmem:[#allocation2 + $0x12] sm:$0xff]  ;;  %v458_v61 = vmul.f32 0.111703366, %v442_v48  ;;  %v506_v10 = vadd.f32 %v490_v40, %v474_v39  ;;  %v538_v42 = vld [vmem:[#allocation2 + $0x1a] sm:$0xf]  ;;  %400 = vst.msk [vmem:[#allocation2 + $0x48] sm:$0xff] %vm390_vm0, %v383_v49  ;;  %v305_v21 = vadd.f32 %v269_v45, %v863_v43 }
 0x116   :  { %v583_v50 = vadd.f32 %v567_v38, %v551_v28  ;;  %v553_v11 = vmul.f32 0.30364123, %v537_v41  ;;  %v584_v51 = vadd.f32 %v568_v55, %v552_v37  ;;  %v554_v62 = vmul.f32 0.30364123, %v538_v42  ;;  %v412_v16 = vld [vmem:[#allocation2 + $0x28] sm:$0xf] }
 0x117   :  { %v521_v52 = vmul.f32 0.23647602, %v505_v9  ;;  %v522_v57 = vmul.f32 0.23647602, %v506_v10  ;;  %v427_v18 = vld [vmem:[#allocation2 + $0x24] sm:$0xff]  ;;  %401 = vst.msk [vmem:[#allocation2 + $0x50] sm:$0xff] %vm390_vm0, %v384_v17  ;;  %v306_v54 = vadd.f32 %v271_v46, %v865_v12  ;;  %v385_v27 = vadd.f32 %v837_v59, %v305_v21 }
 0x118   :  { %599 = vst.msk [vmem:[%s965_s1] sm:$0xff] %vm390_vm0, %v583_v50  ;;  %v428_v19 = vld [vmem:[#allocation2 + $0x2c] sm:$0xf]  ;;  %v475_v20 = vld [vmem:[#allocation2 + $0x21] sm:$0xff]  ;;  %v443_v23 = vadd.f32 %v427_v18, %v411_v13  ;;  %v273_v1 = vpop.permute.xlu1 %272  ;;  %v275_v28 = vpop.permute.xlu0 %274  ;;  %v413_v3 = vld [vmem:[#allocation2 + $0x30] sm:$0xff] }
 0x119   :  { %601 = vst.msk [vmem:[%s965_s1 + $0x8] sm:$0xf] %vm600_vm1, %v584_v51  ;;  %v569_v22 = vadd.f32 %v521_v52, %v457_v56  ;;  %v444_v15 = vadd.f32 %v428_v19, %v412_v16  ;;  %v476_v58 = vld [vmem:[#allocation2 + $0x29] sm:$0xf]  ;;  %v570_v25 = vadd.f32 %v522_v57, %v458_v61  ;;  %v386_v36 = vadd.f32 %v839_v60, %v306_v54 }
 0x11a   :  { %v491_v47 = vld [vmem:[#allocation2 + $0x23] sm:$0xff]  ;;  %v492_v53 = vld [vmem:[#allocation2 + $0x2b] sm:$0xf]  ;;  %v459_v30 = vmul.f32 0.111703366, %v443_v23  ;;  %402 = vst.msk [vmem:[#allocation2 + $0x58] sm:$0xff] %vm390_vm0, %v385_v27  ;;  %v307_v6 = vadd.f32 %v273_v1, %v869_v14  ;;  %v308_v37 = vadd.f32 %v275_v28, %v871_v44 }
 0x11b   :  { %v507_v0 = vadd.f32 %v491_v47, %v475_v20  ;;  %v508_v26 = vadd.f32 %v492_v53, %v476_v58  ;;  %v539_v2 = vld [vmem:[#allocation2 + $0x22] sm:$0xff]  ;;  %v540_v43 = vld [vmem:[#allocation2 + $0x2a] sm:$0xf]  ;;  %v585_v29 = vadd.f32 %v569_v22, %v553_v11  ;;  %v460_v31 = vmul.f32 0.111703366, %v444_v15  ;;  %v429_v59 = vld [vmem:[#allocation2 + $0x34] sm:$0xff] }
 0x11c   :  { %v555_v32 = vmul.f32 0.30364123, %v539_v2  ;;  %v586_v33 = vadd.f32 %v570_v25, %v554_v62  ;;  %v556_v5 = vmul.f32 0.30364123, %v540_v43  ;;  %v414_v12 = vld [vmem:[#allocation2 + $0x38] sm:$0xf]  ;;  %v445_v7 = vadd.f32 %v429_v59, %v413_v3  ;;  %v277_v40 = vpop.permute.xlu1 %276  ;;  %v355_v9 = vpop.permute.xlu0 %354 }
 0x11d   :  { %v523_v4 = vmul.f32 0.23647602, %v507_v0  ;;  %v524_v34 = vmul.f32 0.23647602, %v508_v26  ;;  %602 = vst.msk [vmem:[%s965_s1 + $0x10] sm:$0xff] %vm390_vm0, %v585_v29  ;;  %v477_v8 = vld [vmem:[#allocation2 + $0x31] sm:$0xff]  ;;  %v387_v44 = vadd.f32 %v843_v63, %v307_v6  ;;  %v388_v50 = vadd.f32 %v355_v9, %v308_v37 }
 0x11e   :  { %v430_v35 = vld [vmem:[#allocation2 + $0x3c] sm:$0xf]  ;;  %603 = vst.msk [vmem:[%s965_s1 + $0x18] sm:$0xf] %vm600_vm1, %v586_v33  ;;  %v493_v56 = vld [vmem:[#allocation2 + $0x33] sm:$0xff]  ;;  %v431_v13 = vld [vmem:[#allocation2 + $0x44] sm:$0xff]  ;;  %v309_v62 = vadd.f32 %v277_v40, %v877_v24 }
 0x11f   :  { %v571_v38 = vadd.f32 %v523_v4, %v459_v30  ;;  %v572_v48 = vadd.f32 %v524_v34, %v460_v31  ;;  %v446_v39 = vadd.f32 %v430_v35, %v414_v12  ;;  %v478_v55 = vld [vmem:[#allocation2 + $0x39] sm:$0xf]  ;;  %v509_v60 = vadd.f32 %v493_v56, %v477_v8  ;;  %403 = vst.msk [vmem:[#allocation2 + $0x60] sm:$0xff] %vm390_vm0, %v386_v36  ;;  %v415_v52 = vld [vmem:[#allocation2 + $0x40] sm:$0xff]  ;;  %v416_v63 = vld [vmem:[#allocation2 + $0x48] sm:$0xf] }
 0x120   :  { %v494_v41 = vld [vmem:[#allocation2 + $0x3b] sm:$0xf]  ;;  %v541_v49 = vld [vmem:[#allocation2 + $0x32] sm:$0xff]  ;;  %v461_v42 = vmul.f32 0.111703366, %v445_v7  ;;  %404 = vst.msk [vmem:[#allocation2 + $0x68] sm:$0xff] %vm390_vm0, %v387_v44  ;;  %v447_v17 = vadd.f32 %v431_v13, %v415_v52  ;;  %v357_v18 = vpop.permute.xlu1 %356 }
 0x121   :  { %v542_v14 = vld [vmem:[#allocation2 + $0x3a] sm:$0xf]  ;;  %v587_v61 = vadd.f32 %v571_v38, %v555_v32  ;;  %v588_v10 = vadd.f32 %v572_v48, %v556_v5  ;;  %v462_v11 = vmul.f32 0.111703366, %v446_v39  ;;  %v510_v45 = vadd.f32 %v494_v41, %v478_v55  ;;  %405 = vst.msk [vmem:[#allocation2 + $0x70] sm:$0xff] %vm390_vm0, %v388_v50  ;;  %v479_v57 = vld [vmem:[#allocation2 + $0x41] sm:$0xff] }
 0x122   :  { %v525_v46 = vmul.f32 0.23647602, %v509_v60  ;;  %v557_v51 = vmul.f32 0.30364123, %v541_v49  ;;  %v432_v16 = vld [vmem:[#allocation2 + $0x4c] sm:$0xf]  ;;  %v389_v15 = vadd.f32 %v357_v18, %v309_v62 }
 0x123   :  { %604 = vst.msk [vmem:[%s965_s1 + $0x20] sm:$0xff] %vm390_vm0, %v587_v61  ;;  %v526_v19 = vmul.f32 0.23647602, %v510_v45  ;;  %v448_v24 = vadd.f32 %v432_v16, %v416_v63  ;;  %v480_v21 = vld [vmem:[#allocation2 + $0x49] sm:$0xf]  ;;  %v417_v43 = vld [vmem:[#allocation2 + $0x50] sm:$0xff] }
 0x124   :  { %605 = vst.msk [vmem:[%s965_s1 + $0x28] sm:$0xf] %vm600_vm1, %v588_v10  ;;  %v573_v20 = vadd.f32 %v525_v46, %v461_v42  ;;  %v495_v22 = vld [vmem:[#allocation2 + $0x43] sm:$0xff]  ;;  %v558_v58 = vmul.f32 0.30364123, %v542_v14  ;;  %v433_v1 = vld [vmem:[#allocation2 + $0x54] sm:$0xff] }
 0x125   :  { %v543_v23 = vld [vmem:[#allocation2 + $0x42] sm:$0xff]  ;;  %v463_v47 = vmul.f32 0.111703366, %v447_v17  ;;  %v496_v53 = vld [vmem:[#allocation2 + $0x4b] sm:$0xf]  ;;  %v511_v54 = vadd.f32 %v495_v22, %v479_v57  ;;  %v574_v25 = vadd.f32 %v526_v19, %v462_v11  ;;  %406 = vst.msk [vmem:[#allocation2 + $0x78] sm:$0xff] %vm390_vm0, %v389_v15  ;;  %v449_v31 = vadd.f32 %v433_v1, %v417_v43 }
 0x126   :  { %v589_v0 = vadd.f32 %v573_v20, %v557_v51  ;;  %v464_v26 = vmul.f32 0.111703366, %v448_v24  ;;  %v512_v2 = vadd.f32 %v496_v53, %v480_v21  ;;  %v418_v27 = vld [vmem:[#allocation2 + $0x58] sm:$0xf]  ;;  %v544_v29 = vld [vmem:[#allocation2 + $0x4a] sm:$0xf] }
 0x127   :  { %v527_v28 = vmul.f32 0.23647602, %v511_v54  ;;  %v559_v30 = vmul.f32 0.30364123, %v543_v23  ;;  %v590_v32 = vadd.f32 %v574_v25, %v558_v58  ;;  %v434_v33 = vld [vmem:[#allocation2 + $0x5c] sm:$0xf] }
 0x128   :  { %606 = vst.msk [vmem:[%s965_s1 + $0x30] sm:$0xff] %vm390_vm0, %v589_v0  ;;  %v528_v3 = vmul.f32 0.23647602, %v512_v2  ;;  %v481_v4 = vld [vmem:[#allocation2 + $0x51] sm:$0xff]  ;;  %v450_v12 = vadd.f32 %v434_v33, %v418_v27  ;;  %v465_v59 = vmul.f32 0.111703366, %v449_v31 }
 0x129   :  { %v497_v34 = vld [vmem:[#allocation2 + $0x53] sm:$0xff]  ;;  %v575_v5 = vadd.f32 %v527_v28, %v463_v47  ;;  %v498_v36 = vld [vmem:[#allocation2 + $0x5b] sm:$0xf]  ;;  %607 = vst.msk [vmem:[%s965_s1 + $0x38] sm:$0xf] %vm600_vm1, %v590_v32  ;;  %v419_v40 = vld [vmem:[#allocation2 + $0x60] sm:$0xff] }
 0x12a   :  { %v482_v35 = vld [vmem:[#allocation2 + $0x59] sm:$0xf]  ;;  %v513_v6 = vadd.f32 %v497_v34, %v481_v4  ;;  %v560_v37 = vmul.f32 0.30364123, %v544_v29  ;;  %v576_v38 = vadd.f32 %v528_v3, %v464_v26  ;;  %v466_v55 = vmul.f32 0.111703366, %v450_v12 }
 0x12b   :  { %v514_v48 = vadd.f32 %v498_v36, %v482_v35  ;;  %v545_v7 = vld [vmem:[#allocation2 + $0x52] sm:$0xff]  ;;  %v546_v39 = vld [vmem:[#allocation2 + $0x5a] sm:$0xf]  ;;  %v591_v8 = vadd.f32 %v575_v5, %v559_v30  ;;  %v420_v49 = vld [vmem:[#allocation2 + $0x68] sm:$0xf] }
 0x12c   :  { %v529_v56 = vmul.f32 0.23647602, %v513_v6  ;;  %v592_v9 = vadd.f32 %v576_v38, %v560_v37  ;;  %v561_v60 = vmul.f32 0.30364123, %v545_v7  ;;  %v562_v14 = vmul.f32 0.30364123, %v546_v39 }
 0x12d   :  { %v530_v41 = vmul.f32 0.23647602, %v514_v48  ;;  %608 = vst.msk [vmem:[%s965_s1 + $0x40] sm:$0xff] %vm390_vm0, %v591_v8  ;;  %v435_v50 = vld [vmem:[#allocation2 + $0x64] sm:$0xff]  ;;  %v436_v61 = vld [vmem:[#allocation2 + $0x6c] sm:$0xf] }
 0x12e   :  { %v577_v44 = vadd.f32 %v529_v56, %v465_v59  ;;  %v483_v10 = vld [vmem:[#allocation2 + $0x61] sm:$0xff]  ;;  %609 = vst.msk [vmem:[%s965_s1 + $0x48] sm:$0xf] %vm600_vm1, %v592_v9  ;;  %v451_v11 = vadd.f32 %v435_v50, %v419_v40  ;;  %v452_v13 = vadd.f32 %v436_v61, %v420_v49  ;;  %v484_v45 = vld [vmem:[#allocation2 + $0x69] sm:$0xf]  ;;  %v421_v24 = vld [vmem:[#allocation2 + $0x70] sm:$0xff] }
 0x12f   :  { %v578_v42 = vadd.f32 %v530_v41, %v466_v55  ;;  %v499_v46 = vld [vmem:[#allocation2 + $0x63] sm:$0xff]  ;;  %v500_v51 = vld [vmem:[#allocation2 + $0x6b] sm:$0xf]  ;;  %v422_v15 = vld [vmem:[#allocation2 + $0x78] sm:$0xf] }
 0x130   :  { %v593_v52 = vadd.f32 %v577_v44, %v561_v60  ;;  %v515_v62 = vadd.f32 %v499_v46, %v483_v10  ;;  %v516_v63 = vadd.f32 %v500_v51, %v484_v45  ;;  %v547_v16 = vld [vmem:[#allocation2 + $0x62] sm:$0xff]  ;;  %v548_v17 = vld [vmem:[#allocation2 + $0x6a] sm:$0xf]  ;;  %v467_v18 = vmul.f32 0.111703366, %v451_v11  ;;  %v437_v58 = vld [vmem:[#allocation2 + $0x74] sm:$0xff] }
 0x131   :  { %v594_v57 = vadd.f32 %v578_v42, %v562_v14  ;;  %v468_v19 = vmul.f32 0.111703366, %v452_v13  ;;  %v563_v20 = vmul.f32 0.30364123, %v547_v16  ;;  %v564_v23 = vmul.f32 0.30364123, %v548_v17 }
 0x132   :  { %610 = vst.msk [vmem:[%s965_s1 + $0x50] sm:$0xff] %vm390_vm0, %v593_v52  ;;  %v531_v21 = vmul.f32 0.23647602, %v515_v62  ;;  %v532_v22 = vmul.f32 0.23647602, %v516_v63  ;;  %v453_v25 = vadd.f32 %v437_v58, %v421_v24  ;;  %v485_v26 = vld [vmem:[#allocation2 + $0x71] sm:$0xff] }
 0x133   :  { %611 = vst.msk [vmem:[%s965_s1 + $0x58] sm:$0xf] %vm600_vm1, %v594_v57  ;;  %v438_v47 = vld [vmem:[#allocation2 + $0x7c] sm:$0xf]  ;;  %v501_v43 = vld [vmem:[#allocation2 + $0x73] sm:$0xff] }
 0x134   :  { %v579_v53 = vadd.f32 %v531_v21, %v467_v18  ;;  %v580_v54 = vadd.f32 %v532_v22, %v468_v19  ;;  %v454_v0 = vadd.f32 %v438_v47, %v422_v15  ;;  %v486_v2 = vld [vmem:[#allocation2 + $0x79] sm:$0xf]  ;;  %v517_v1 = vadd.f32 %v501_v43, %v485_v26 }
 0x135   :  { %v502_v27 = vld [vmem:[#allocation2 + $0x7b] sm:$0xf]  ;;  %v469_v30 = vmul.f32 0.111703366, %v453_v25  ;;  %v549_v31 = vld [vmem:[#allocation2 + $0x72] sm:$0xff] }
 0x136   :  { %v595_v28 = vadd.f32 %v579_v53, %v563_v20  ;;  %v596_v29 = vadd.f32 %v580_v54, %v564_v23  ;;  %v470_v32 = vmul.f32 0.111703366, %v454_v0  ;;  %v518_v3 = vadd.f32 %v502_v27, %v486_v2  ;;  %v550_v4 = vld [vmem:[#allocation2 + $0x7a] sm:$0xf] }
 0x137   :  { %v533_v33 = vmul.f32 0.23647602, %v517_v1  ;;  %v565_v5 = vmul.f32 0.30364123, %v549_v31  ;;  %v566_v59 = vmul.f32 0.30364123, %v550_v4 }
 0x138   :  { %612 = vst.msk [vmem:[%s965_s1 + $0x60] sm:$0xff] %vm390_vm0, %v595_v28  ;;  %v534_v34 = vmul.f32 0.23647602, %v518_v3 }
 0x139   :  { %613 = vst.msk [vmem:[%s965_s1 + $0x68] sm:$0xf] %vm600_vm1, %v596_v29  ;;  %v581_v12 = vadd.f32 %v533_v33, %v469_v30 }
 0x13a   :  { %v582_v35 = vadd.f32 %v534_v34, %v470_v32 }
 0x13b   :  { %v597_v36 = vadd.f32 %v581_v12, %v565_v5 }
 0x13c   :  { %v598_v6 = vadd.f32 %v582_v35, %v566_v59 }
 0x13d   :  { %614 = vst.msk [vmem:[%s965_s1 + $0x70] sm:$0xff] %vm390_vm0, %v597_v36 }
 0x13e   :  { %615 = vst.msk [vmem:[%s965_s1 + $0x78] sm:$0xf] %vm600_vm1, %v598_v6 }
 0x13f   :  { %620 = vsyncpa [#allocation4], 1 }

</bundles_post_ra>
